<compile_context>
chip_gen: v7x
topology: tpu7x:2x2x1
jax: 0.10.0
libtpu: 0.0.40
codegen_flags: <defaults>
</compile_context>

<pallas_src>
import math
import functools

import jax
import jax.numpy as jnp
from jax.experimental import pallas as pl
from jax.experimental.pallas import tpu as pltpu


def _round_up(x, m):
    return ((x + m - 1) // m) * m


def _cdiv(a, b):
    return (a + b - 1) // b


_TARGET_BLOCK_BYTES = 4 << 20          # ~4 MiB streamed block target
_F32_TILE_BUDGET_BYTES = 2 << 20       # cap on the f32 (TB, TC) in-kernel tile
_VMEM_LIMIT_BYTES = 32 * 1024 * 1024   # raises v5e's 16 MiB scoped default; default on v6e/v7x


def _sublane_granularity(dtype):
    # f32 -> 8, bf16 -> 16, int8/fp8 -> 32 (sub-32-bit dtypes pack along sublanes).
    return 8 * max(1, 4 // jnp.dtype(dtype).itemsize)


def _pick_batch_tile(batch, granularity):
    # >= 2 programs on the "parallel" batch axis whenever possible so both v7x
    # TensorCores get work; capped at 128 sublanes.
    return min(128, _round_up(max(_cdiv(batch, 2), 1), granularity))


def _static_params(margin, scale, easy_margin, label_smoothing, num_classes, class_tile):
    return dict(
        cos_m=math.cos(margin),
        sin_m=math.sin(margin),
        th=math.cos(math.pi - margin),
        mmm=1.0 + math.cos(math.pi - margin),
        scale=float(scale),
        easy_margin=bool(easy_margin),
        label_smoothing=float(label_smoothing),
        num_classes=int(num_classes),
        class_tile=int(class_tile),
    )


def _aam_update(labels, logits, out_ref, m_ref, l_ref, t_ref, s_ref, *,
                cos_m, sin_m, th, mmm, scale, easy_margin,
                label_smoothing, num_classes, class_tile):
    """Margin + online-softmax update for one (TB, TC) tile of f32 cosines.

    labels: (TB, 1) int32.  logits: (TB, TC) float32 cosines for this class tile.
    Columns >= num_classes - base (ragged last tile / lane padding) may contain
    garbage and are masked in-kernel.
    """
    k = pl.program_id(1)

    @pl.when(k == 0)
    def _init():
        m_ref[...] = jnp.full(m_ref.shape, -jnp.inf, dtype=jnp.float32)
        l_ref[...] = jnp.zeros(l_ref.shape, dtype=jnp.float32)
        t_ref[...] = jnp.zeros(t_ref.shape, dtype=jnp.float32)
        if label_smoothing != 0.0:
            s_ref[...] = jnp.zeros(s_ref.shape, dtype=jnp.float32)

    base = k * class_tile
    rel = labels - base                                          # (TB, 1)
    in_tile = (rel >= 0) & (rel < class_tile)                    # (TB, 1) bool

    col = jax.lax.broadcasted_iota(jnp.int32, logits.shape, 1)   # (TB, TC)
    is_target = col == rel                                       # target position (bool)
    valid = col < (num_classes - base)                           # masks ragged last tile

    # Margin math only on the (TB, 1) target cosine (never on the full tile).
    t_cos = jnp.sum(jnp.where(is_target, logits, 0.0), axis=-1, keepdims=True)
    # clamp: normalized dot products can round slightly past |1| -> NaN in sqrt
    sine = jnp.sqrt(jnp.clip(1.0 - t_cos * t_cos, 0.0, 1.0))
    phi = t_cos * cos_m - sine * sin_m
    if easy_margin:
        phi = jnp.where(t_cos > 0.0, phi, t_cos)
    else:
        phi = jnp.where(t_cos > th, phi, t_cos - mmm)
    phi_s = phi * scale                                          # (TB, 1)

    out_t = jnp.where(is_target, phi_s, logits * scale)          # margined, scaled
    out_m = jnp.where(valid, out_t, -jnp.inf)                    # drop ragged columns

    # Online softmax accumulation across class tiles.
    m_prev = m_ref[...]
    m_new = jnp.maximum(m_prev, jnp.max(out_m, axis=-1, keepdims=True))
    alpha = jnp.exp(m_prev - m_new)
    p_sum = jnp.sum(jnp.exp(out_m - m_new), axis=-1, keepdims=True)
    l_ref[...] = l_ref[...] * alpha + p_sum
    m_ref[...] = m_new

    # Scaled target logit added exactly once per row (when its tile comes by).
    t_ref[...] += jnp.where(in_tile, phi_s, 0.0)

    if label_smoothing != 0.0:
        s_ref[...] += jnp.sum(jnp.where(valid, out_t, 0.0), axis=-1, keepdims=True)

    @pl.when(k == pl.num_programs(1) - 1)
    def _finalize():
        lse = m_ref[...] + jnp.log(l_ref[...])                   # (TB, 1)
        expected = t_ref[...]
        if label_smoothing != 0.0:
            expected = ((1.0 - label_smoothing) * t_ref[...]
                        + label_smoothing * (s_ref[...] / num_classes))
        per_sample = lse - expected
        # Lane-dense write (full 128-lane vst); column 0 is consumed in JAX.
        out_ref[...] = jnp.broadcast_to(per_sample, out_ref.shape)


def _aam_loss_kernel(labels_ref, logits_ref, out_ref,
                     m_ref, l_ref, t_ref, s_ref, **params):
    logits = logits_ref[...].astype(jnp.float32)                 # bf16 or f32 in HBM
    _aam_update(labels_ref[...], logits, out_ref, m_ref, l_ref, t_ref, s_ref, **params)


def _aam_loss_fused_kernel(labels_ref, feat_ref, w_ref, out_ref,
                           m_ref, l_ref, t_ref, s_ref, **params):
    # MXU: (TB, D) x (TC, D)^T -> (TB, TC) cosines with f32 accumulation; the
    # (B, C) logits never touch HBM.
    logits = jax.lax.dot_general(
        feat_ref[...], w_ref[...],
        dimension_numbers=(((1,), (1,)), ((), ())),
        preferred_element_type=jnp.float32)
    _aam_update(labels_ref[...], logits, out_ref, m_ref, l_ref, t_ref, s_ref, **params)


def _compiler_params():
    return pltpu.CompilerParams(
        dimension_semantics=("parallel", "arbitrary"),
        vmem_limit_bytes=_VMEM_LIMIT_BYTES)


def aam_loss(logits, labels, *, margin=0.2, scale=32.0, easy_margin=False,
             label_smoothing=0.0, batch_tile=None, class_tile=None):
    """AAMLoss.forward on precomputed cosine logits.

    logits: (B, C) float32 or bfloat16 cosine similarities.
    labels: (B,) integer class indices.
    Returns a scalar float32 loss (mean label-smoothed cross-entropy).
    """
    B, C = logits.shape
    itemsize = jnp.dtype(logits.dtype).itemsize
    gran = _sublane_granularity(logits.dtype)

    if batch_tile is None:
        batch_tile = _pick_batch_tile(B, gran)
    batch_tile = _round_up(batch_tile, gran)

    if class_tile is None:
        ct_stream = _TARGET_BLOCK_BYTES // (itemsize * batch_tile)
        ct_f32 = _F32_TILE_BUDGET_BYTES // (4 * batch_tile)
        class_tile = max(2048, min(ct_stream, ct_f32))
    class_tile = min(_round_up(class_tile, 128), _round_up(C, 128))

    labels2d = labels.astype(jnp.int32).reshape(B, 1)
    grid = (_cdiv(B, batch_tile), _cdiv(C, class_tile))

    kernel = functools.partial(
        _aam_loss_kernel,
        **_static_params(margin, scale, easy_margin, label_smoothing, C, class_tile))

    per_sample = pl.pallas_call(
        kernel,
        out_shape=jax.ShapeDtypeStruct((B, 128), jnp.float32),
        grid_spec=pltpu.PrefetchScalarGridSpec(
            num_scalar_prefetch=0,
            grid=grid,
            in_specs=[
                # labels stay resident across the class (reduction) axis
                pl.BlockSpec((batch_tile, 1), lambda i, k: (i, 0)),
                # logits stream tile-by-tile with auto double-buffering
                pl.BlockSpec((batch_tile, class_tile), lambda i, k: (i, k)),
            ],
            out_specs=pl.BlockSpec((batch_tile, 128), lambda i, k: (i, 0)),
            scratch_shapes=[pltpu.VMEM((batch_tile, 1), jnp.float32)] * 4),
        compiler_params=_compiler_params(),
    )(labels2d, logits)

    # TODO(synk): the final length-B mean stays in XLA (tiny); fold it into the
    # kernel only if the per-sample vector must never hit HBM.
    return jnp.mean(per_sample[:, 0])


def aam_loss_fused(features, class_weight, labels, *, margin=0.2, scale=32.0,
                   easy_margin=False, label_smoothing=0.0,
                   batch_tile=None, class_tile=None):
    """Fused classifier + AAMLoss.

    features:     (B, D) L2-normalized embeddings (bf16 recommended).
    class_weight: (C, D) L2-normalized class weights (bf16 recommended).
    The cosine matmul runs on the MXU inside the kernel per class tile, so the
    (B, C) logits never round-trip HBM.
    """
    B, D = features.shape
    C, Dw = class_weight.shape
    assert D == Dw, (features.shape, class_weight.shape)
    w_itemsize = jnp.dtype(class_weight.dtype).itemsize
    gran = _sublane_granularity(features.dtype)

    if batch_tile is None:
        batch_tile = _pick_batch_tile(B, gran)
    batch_tile = _round_up(batch_tile, gran)

    if class_tile is None:
        ct_w = _TARGET_BLOCK_BYTES // (w_itemsize * D)          # weight-stream block target
        ct_f32 = _F32_TILE_BUDGET_BYTES // (4 * batch_tile)     # in-kernel f32 logits tile
        class_tile = max(512, min(ct_w, ct_f32))
    class_tile = min(_round_up(class_tile, 128), _round_up(C, 128))

    labels2d = labels.astype(jnp.int32).reshape(B, 1)
    grid = (_cdiv(B, batch_tile), _cdiv(C, class_tile))

    kernel = functools.partial(
        _aam_loss_fused_kernel,
        **_static_params(margin, scale, easy_margin, label_smoothing, C, class_tile))

    per_sample = pl.pallas_call(
        kernel,
        out_shape=jax.ShapeDtypeStruct((B, 128), jnp.float32),
        grid_spec=pltpu.PrefetchScalarGridSpec(
            num_scalar_prefetch=0,
            grid=grid,
            in_specs=[
                pl.BlockSpec((batch_tile, 1), lambda i, k: (i, 0)),   # labels (resident)
                pl.BlockSpec((batch_tile, D), lambda i, k: (i, 0)),   # features (resident)
                pl.BlockSpec((class_tile, D), lambda i, k: (k, 0)),   # weight slab (streamed)
            ],
            out_specs=pl.BlockSpec((batch_tile, 128), lambda i, k: (i, 0)),
            scratch_shapes=[pltpu.VMEM((batch_tile, 1), jnp.float32)] * 4),
        compiler_params=_compiler_params(),
    )(labels2d, features, class_weight)

    return jnp.mean(per_sample[:, 0])


def _reference_aam_loss(logits, labels, *, margin=0.2, scale=32.0,
                        easy_margin=False, label_smoothing=0.0):
    """Pure-JAX reference mirroring the PyTorch forward."""
    cos_m, sin_m = math.cos(margin), math.sin(margin)
    th = math.cos(math.pi - margin)
    mmm = 1.0 + math.cos(math.pi - margin)
    logits = logits.astype(jnp.float32)
    sine = jnp.sqrt(jnp.clip(1.0 - logits ** 2, 0.0, 1.0))
    phi = logits * cos_m - sine * sin_m
    if easy_margin:
        phi = jnp.where(logits > 0, phi, logits)
    else:
        phi = jnp.where(logits > th, phi, logits - mmm)
    one_hot = jax.nn.one_hot(labels, logits.shape[1], dtype=logits.dtype)
    output = (one_hot * phi + (1.0 - one_hot) * logits) * scale
    logp = jax.nn.log_softmax(output, axis=-1)
    C = logits.shape[1]
    target = (1.0 - label_smoothing) * one_hot + label_smoothing / C
    return jnp.mean(-jnp.sum(target * logp, axis=-1))


if __name__ == "__main__":
    key = jax.random.PRNGKey(0)
    k_feat, k_w, k_lab = jax.random.split(key, 3)

    batch, feat_dim, num_classes = 16, 128, 1000

    features = jax.random.normal(k_feat, (batch, feat_dim), dtype=jnp.float32)
    class_w = jax.random.normal(k_w, (num_classes, feat_dim), dtype=jnp.float32)
    feat_n = features / jnp.linalg.norm(features, axis=-1, keepdims=True)
    w_n = class_w / jnp.linalg.norm(class_w, axis=-1, keepdims=True)
    labels = jax.random.randint(k_lab, (batch,), 0, num_classes, dtype=jnp.int32)

    logits_f32 = jnp.dot(feat_n, w_n.T, precision=jax.lax.Precision.HIGHEST)
    logits_bf16 = logits_f32.astype(jnp.bfloat16)

    cfg_a = dict(margin=0.2, scale=32.0, easy_margin=False, label_smoothing=0.0)
    cfg_b = dict(margin=0.2, scale=32.0, easy_margin=True, label_smoothing=0.1)

    # 1) unfused, f32 logits, default tiling; C=1000 exercises the in-kernel
    #    ragged class-tile masking (no XLA-side pad pass).
    loss = jax.block_until_ready(aam_loss(logits_f32, labels, **cfg_a))
    ref = _reference_aam_loss(logits_f32, labels, **cfg_a)
    assert jnp.allclose(loss, ref, rtol=1e-4, atol=1e-4), ("cfg_a f32", loss, ref)

    # 2) unfused, bf16 logits (half the HBM read), small explicit tiles ->
    #    multi-tile online softmax + ragged last tile + easy_margin + smoothing.
    loss = jax.block_until_ready(
        aam_loss(logits_bf16, labels, **cfg_b, batch_tile=8, class_tile=256))
    ref = _reference_aam_loss(logits_bf16.astype(jnp.float32), labels, **cfg_b)
    assert jnp.allclose(loss, ref, rtol=1e-4, atol=1e-4), ("cfg_b bf16", loss, ref)

    # 3) fused classifier matmul + loss (bf16 features/weights on the MXU).
    feat_b = feat_n.astype(jnp.bfloat16)
    w_b = w_n.astype(jnp.bfloat16)
    logits_from_b = jnp.dot(feat_b.astype(jnp.float32), w_b.astype(jnp.float32).T,
                            precision=jax.lax.Precision.HIGHEST)
    loss = jax.block_until_ready(aam_loss_fused(feat_b, w_b, labels, **cfg_a))
    ref = _reference_aam_loss(logits_from_b, labels, **cfg_a)
    assert jnp.allclose(loss, ref, rtol=5e-4, atol=2e-3), ("fused cfg_a", loss, ref)

    # 4) fused, small explicit class tiles (weight slab streamed in ragged chunks)
    #    + easy_margin + label smoothing.
    loss = jax.block_until_ready(
        aam_loss_fused(feat_b, w_b, labels, **cfg_b, batch_tile=8, class_tile=256))
    ref = _reference_aam_loss(logits_from_b, labels, **cfg_b)
    assert jnp.allclose(loss, ref, rtol=5e-4, atol=2e-3), ("fused cfg_b", loss, ref)

    print("KERNEL_OK")
</pallas_src>

<mosaic_0001>
module attributes {stable_mosaic.version = 11 : i64} {
  func.func @_aam_loss_kernel(%arg0: i32, %arg1: i32, %arg2: memref<8x1xi32, #tpu.memory_space<vmem>>, %arg3: memref<8x1024xf32, #tpu.memory_space<vmem>>, %arg4: memref<8x128xf32, #tpu.memory_space<vmem>>, %arg5: memref<8x1xf32, #tpu.memory_space<vmem>>, %arg6: memref<8x1xf32, #tpu.memory_space<vmem>>, %arg7: memref<8x1xf32, #tpu.memory_space<vmem>>, %arg8: memref<8x1xf32, #tpu.memory_space<vmem>>) attributes {dimension_semantics = [#tpu.dimension_semantics<parallel>, #tpu.dimension_semantics<arbitrary>], iteration_bounds = array<i64: 2, 1>, scalar_prefetch = 0 : i64, scratch_operands = 4 : i64, tpu.core_type = #tpu.core_type<tc>, window_params = [{transform_indices = @transform_0, window_bounds = array<i64: 8, 1>}, {transform_indices = @transform_1, window_bounds = array<i64: 8, 1024>}, {transform_indices = @transform_2, window_bounds = array<i64: 8, 128>}]} {
    %c0 = arith.constant 0 : index
    %c0_0 = arith.constant 0 : index
    %0 = vector.load %arg3[%c0, %c0_0] : memref<8x1024xf32, #tpu.memory_space<vmem>>, vector<8x1024xf32>
    %c0_1 = arith.constant 0 : index
    %c0_2 = arith.constant 0 : index
    %1 = vector.load %arg2[%c0_1, %c0_2] : memref<8x1xi32, #tpu.memory_space<vmem>>, vector<8x1xi32>
    %c0_i32 = arith.constant 0 : i32
    %2 = arith.cmpi eq, %arg1, %c0_i32 : i32
    %3 = arith.extui %2 : i1 to i32
    %c0_i32_3 = arith.constant 0 : i32
    %4 = arith.cmpi ne, %3, %c0_i32_3 : i32
    scf.if %4 {
      %cst_34 = arith.constant 0xFF800000 : f32
      %74 = vector.broadcast %cst_34 : f32 to vector<8x1xf32>
      %c0_35 = arith.constant 0 : index
      %c0_36 = arith.constant 0 : index
      %75 = vector.load %arg5[%c0_35, %c0_36] : memref<8x1xf32, #tpu.memory_space<vmem>>, vector<8x1xf32>
      tpu.vector_store %arg5[%c0_35, %c0_36], %74 {strides = array<i32>} : memref<8x1xf32, #tpu.memory_space<vmem>>, vector<8x1xf32>,
      %cst_37 = arith.constant 0.000000e+00 : f32
      %76 = vector.broadcast %cst_37 : f32 to vector<8x1xf32>
      %c0_38 = arith.constant 0 : index
      %c0_39 = arith.constant 0 : index
      %77 = vector.load %arg6[%c0_38, %c0_39] : memref<8x1xf32, #tpu.memory_space<vmem>>, vector<8x1xf32>
      tpu.vector_store %arg6[%c0_38, %c0_39], %76 {strides = array<i32>} : memref<8x1xf32, #tpu.memory_space<vmem>>, vector<8x1xf32>,
      %cst_40 = arith.constant 0.000000e+00 : f32
      %78 = vector.broadcast %cst_40 : f32 to vector<8x1xf32>
      %c0_41 = arith.constant 0 : index
      %c0_42 = arith.constant 0 : index
      %79 = vector.load %arg7[%c0_41, %c0_42] : memref<8x1xf32, #tpu.memory_space<vmem>>, vector<8x1xf32>
      tpu.vector_store %arg7[%c0_41, %c0_42], %78 {strides = array<i32>} : memref<8x1xf32, #tpu.memory_space<vmem>>, vector<8x1xf32>,
    } else {
    }
    %c1024_i32 = arith.constant 1024 : i32
    %5 = arith.muli %arg1, %c1024_i32 : i32
    %6 = vector.broadcast %5 : i32 to vector<8x1xi32>
    %7 = arith.subi %1, %6 : vector<8x1xi32>
    %c0_i32_4 = arith.constant 0 : i32
    %8 = vector.broadcast %c0_i32_4 : i32 to vector<8x1xi32>
    %9 = arith.cmpi sge, %7, %8 : vector<8x1xi32>
    %c1024_i32_5 = arith.constant 1024 : i32
    %10 = vector.broadcast %c1024_i32_5 : i32 to vector<8x1xi32>
    %11 = arith.cmpi slt, %7, %10 : vector<8x1xi32>
    %12 = arith.andi %9, %11 : vector<8x1xi1>
    %13 = tpu.iota {dimensions = array<i32: 1>} : vector<8x1024xi32>
    %14 = vector.broadcast %7 : vector<8x1xi32> to vector<8x1024xi32>
    %15 = arith.cmpi eq, %13, %14 : vector<8x1024xi32>
    %c1000_i32 = arith.constant 1000 : i32
    %16 = arith.subi %c1000_i32, %5 : i32
    %17 = vector.broadcast %16 : i32 to vector<8x1024xi32>
    %18 = arith.cmpi slt, %13, %17 : vector<8x1024xi32>
    %cst = arith.constant 0.000000e+00 : f32
    %19 = vector.broadcast %cst : f32 to vector<8x1024xf32>
    %20 = arith.select %15, %0, %19 : vector<8x1024xi1>, vector<8x1024xf32>
    %cst_6 = arith.constant dense<0.000000e+00> : vector<8xf32>
    %21 = vector.multi_reduction <add>, %20, %cst_6 [1] : vector<8x1024xf32> to vector<8xf32>
    %22 = vector.shape_cast %21 : vector<8xf32> to vector<8x1xf32>
    %23 = arith.mulf %22, %22 : vector<8x1xf32>
    %cst_7 = arith.constant 1.000000e+00 : f32
    %24 = vector.broadcast %cst_7 : f32 to vector<8x1xf32>
    %25 = arith.subf %24, %23 : vector<8x1xf32>
    %cst_8 = arith.constant 0.000000e+00 : f32
    %cst_9 = arith.constant 1.000000e+00 : f32
    %26 = vector.broadcast %cst_8 : f32 to vector<8x1xf32>
    %27 = arith.maximumf %26, %25 : vector<8x1xf32>
    %28 = vector.broadcast %cst_9 : f32 to vector<8x1xf32>
    %29 = arith.minimumf %28, %27 : vector<8x1xf32>
    %30 = math.sqrt %29 : vector<8x1xf32>
    %cst_10 = arith.constant 0.980066597 : f32
    %31 = vector.broadcast %cst_10 : f32 to vector<8x1xf32>
    %32 = arith.mulf %22, %31 : vector<8x1xf32>
    %cst_11 = arith.constant 0.198669329 : f32
    %33 = vector.broadcast %cst_11 : f32 to vector<8x1xf32>
    %34 = arith.mulf %30, %33 : vector<8x1xf32>
    %35 = arith.subf %32, %34 : vector<8x1xf32>
    %cst_12 = arith.constant -0.980066597 : f32
    %36 = vector.broadcast %cst_12 : f32 to vector<8x1xf32>
    %37 = arith.cmpf ogt, %22, %36 : vector<8x1xf32>
    %cst_13 = arith.constant 0.019933423 : f32
    %38 = vector.broadcast %cst_13 : f32 to vector<8x1xf32>
    %39 = arith.subf %22, %38 : vector<8x1xf32>
    %40 = arith.select %37, %35, %39 : vector<8x1xi1>, vector<8x1xf32>
    %cst_14 = arith.constant 3.200000e+01 : f32
    %41 = vector.broadcast %cst_14 : f32 to vector<8x1xf32>
    %42 = arith.mulf %40, %41 : vector<8x1xf32>
    %cst_15 = arith.constant 3.200000e+01 : f32
    %43 = vector.broadcast %cst_15 : f32 to vector<8x1024xf32>
    %44 = arith.mulf %0, %43 : vector<8x1024xf32>
    %45 = vector.shape_cast %42 : vector<8x1xf32> to vector<8x1xf32>
    %46 = vector.broadcast %45 : vector<8x1xf32> to vector<8x1024xf32>
    %47 = arith.select %15, %46, %44 : vector<8x1024xi1>, vector<8x1024xf32>
    %cst_16 = arith.constant 0xFF800000 : f32
    %48 = vector.broadcast %cst_16 : f32 to vector<8x1024xf32>
    %49 = arith.select %18, %47, %48 : vector<8x1024xi1>, vector<8x1024xf32>
    %c0_17 = arith.constant 0 : index
    %c0_18 = arith.constant 0 : index
    %50 = vector.load %arg5[%c0_17, %c0_18] : memref<8x1xf32, #tpu.memory_space<vmem>>, vector<8x1xf32>
    %cst_19 = arith.constant dense<0xFF800000> : vector<8xf32>
    %51 = vector.multi_reduction <maximumf>, %49, %cst_19 [1] : vector<8x1024xf32> to vector<8xf32>
    %52 = vector.shape_cast %51 : vector<8xf32> to vector<8x1xf32>
    %53 = arith.maximumf %50, %52 : vector<8x1xf32>
    %54 = arith.subf %50, %53 : vector<8x1xf32>
    %55 = math.exp %54 : vector<8x1xf32>
    %56 = vector.broadcast %53 : vector<8x1xf32> to vector<8x1024xf32>
    %57 = arith.subf %49, %56 : vector<8x1024xf32>
    %58 = math.exp %57 : vector<8x1024xf32>
    %cst_20 = arith.constant dense<0.000000e+00> : vector<8xf32>
    %59 = vector.multi_reduction <add>, %58, %cst_20 [1] : vector<8x1024xf32> to vector<8xf32>
    %60 = vector.shape_cast %59 : vector<8xf32> to vector<8x1xf32>
    %c0_21 = arith.constant 0 : index
    %c0_22 = arith.constant 0 : index
    %61 = vector.load %arg6[%c0_21, %c0_22] : memref<8x1xf32, #tpu.memory_space<vmem>>, vector<8x1xf32>
    %62 = arith.mulf %61, %55 : vector<8x1xf32>
    %63 = arith.addf %62, %60 : vector<8x1xf32>
    %c0_23 = arith.constant 0 : index
    %c0_24 = arith.constant 0 : index
    %64 = vector.load %arg6[%c0_23, %c0_24] : memref<8x1xf32, #tpu.memory_space<vmem>>, vector<8x1xf32>
    tpu.vector_store %arg6[%c0_23, %c0_24], %63 {strides = array<i32>} : memref<8x1xf32, #tpu.memory_space<vmem>>, vector<8x1xf32>,
    %c0_25 = arith.constant 0 : index
    %c0_26 = arith.constant 0 : index
    %65 = vector.load %arg5[%c0_25, %c0_26] : memref<8x1xf32, #tpu.memory_space<vmem>>, vector<8x1xf32>
    tpu.vector_store %arg5[%c0_25, %c0_26], %53 {strides = array<i32>} : memref<8x1xf32, #tpu.memory_space<vmem>>, vector<8x1xf32>,
    %c0_27 = arith.constant 0 : index
    %c0_28 = arith.constant 0 : index
    %66 = vector.load %arg7[%c0_27, %c0_28] : memref<8x1xf32, #tpu.memory_space<vmem>>, vector<8x1xf32>
    %cst_29 = arith.constant 0.000000e+00 : f32
    %67 = vector.broadcast %cst_29 : f32 to vector<8x1xf32>
    %68 = arith.select %12, %42, %67 : vector<8x1xi1>, vector<8x1xf32>
    %69 = arith.addf %66, %68 : vector<8x1xf32>
    %c0_30 = arith.constant 0 : index
    %c0_31 = arith.constant 0 : index
    %70 = vector.load %arg7[%c0_30, %c0_31] : memref<8x1xf32, #tpu.memory_space<vmem>>, vector<8x1xf32>
    tpu.vector_store %arg7[%c0_30, %c0_31], %69 {strides = array<i32>} : memref<8x1xf32, #tpu.memory_space<vmem>>, vector<8x1xf32>,
    %c0_i32_32 = arith.constant 0 : i32
    %71 = arith.cmpi eq, %arg1, %c0_i32_32 : i32
    %72 = arith.extui %71 : i1 to i32
    %c0_i32_33 = arith.constant 0 : i32
    %73 = arith.cmpi ne, %72, %c0_i32_33 : i32
    scf.if %73 {
      %c0_34 = arith.constant 0 : index
      %c0_35 = arith.constant 0 : index
      %74 = vector.load %arg5[%c0_34, %c0_35] : memref<8x1xf32, #tpu.memory_space<vmem>>, vector<8x1xf32>
      %c0_36 = arith.constant 0 : index
      %c0_37 = arith.constant 0 : index
      %75 = vector.load %arg6[%c0_36, %c0_37] : memref<8x1xf32, #tpu.memory_space<vmem>>, vector<8x1xf32>
      %76 = math.log %75 : vector<8x1xf32>
      %77 = arith.addf %74, %76 : vector<8x1xf32>
      %c0_38 = arith.constant 0 : index
      %c0_39 = arith.constant 0 : index
      %78 = vector.load %arg7[%c0_38, %c0_39] : memref<8x1xf32, #tpu.memory_space<vmem>>, vector<8x1xf32>
      %79 = arith.subf %77, %78 : vector<8x1xf32>
      %80 = vector.shape_cast %79 : vector<8x1xf32> to vector<8x1xf32>
      %81 = vector.broadcast %80 : vector<8x1xf32> to vector<8x128xf32>
      %c0_40 = arith.constant 0 : index
      %c0_41 = arith.constant 0 : index
      %82 = vector.load %arg4[%c0_40, %c0_41] : memref<8x128xf32, #tpu.memory_space<vmem>>, vector<8x128xf32>
      tpu.vector_store %arg4[%c0_40, %c0_41], %81 {strides = array<i32>} : memref<8x128xf32, #tpu.memory_space<vmem>>, vector<8x128xf32>,
    } else {
    }
    return
  }
  func.func @transform_0(%arg0: i32, %arg1: i32) -> (i32, i32) {
    %c0_i32 = arith.constant 0 : i32
    %c0_i32_0 = arith.constant 0 : i32
    return %arg0, %c0_i32 : i32, i32
  }
  func.func @transform_1(%arg0: i32, %arg1: i32) -> (i32, i32) {
    %c0_i32 = arith.constant 0 : i32
    return %arg0, %arg1 : i32, i32
  }
  func.func @transform_2(%arg0: i32, %arg1: i32) -> (i32, i32) {
    %c0_i32 = arith.constant 0 : i32
    %c0_i32_0 = arith.constant 0 : i32
    return %arg0, %c0_i32 : i32, i32
  }
}

</mosaic_0001>

<bundles_post_ra>
// kernel: tpu_custom_call.1
= control target key start
LH: loop header
LB: loop body
LE: loop exit
PB: predicated region body
PF: predicated region fallthrough
CT: control target
= control target key end

     0   :  { %7 = vsyncpa [#allocation7], 0  ;;  %s1034_s0 = inlined_call_operand.vmem [shape: s32[16,1], index: 0, kind: input, shape index: {}]   ;;  %s1035_s1 = inlined_call_operand.hbm [shape: f32[16,1000], index: 1, kind: input, shape index: {}]   ;;  %s1036_s2 = inlined_call_operand.hbm [shape: f32[16,128], index: 2, kind: output, shape index: {}]  }
   0x1   :  { %9 = vsyncpa [#allocation7 + $0x1], 0 }
   0x2   :  { %10 = vsyncpa [#allocation8], 0 }
   0x3   :  { %12 = vsyncpa [#allocation8 + $0x1], 0  ;;  %s731_s9 = smov 0   ;;  %s733_s10 = smov 0  }
   0x4   :  { %s735_s11 = smov 0   ;;  %s737_s12 = smov 0  }
   0x5   :  { %s739_s13 = smov 0   ;;  %s741_s14 = smov 0  }
   0x6 LB: > { %s491_s15 = sadd.s32 4294967295, %s709_s14   ;;  %s492_s16 = sadd.s32 4294967294, %s709_s14   ;;  %s709_s14 = sphi %s741_s14, %s18_s14   ;;  %s705_s13 = sphi %s739_s13, %s1054_s13   ;;  %s701_s12 = sphi %s737_s12, %s1053_s12   ;;  %s697_s11 = sphi %s735_s11, %s1052_s11   ;;  %s693_s10 = sphi %s733_s10, %s1051_s10   ;;  %s689_s9 = sphi %s731_s9, %s1050_s9  }
   0x7   : > { %s30_s17 = sadd.s32 1, %s705_s13  ;;  %s65_s18 = sadd.s32 1, %s697_s11 }
   0x8   : > { %p32_p0 = scmp.ge.s32.totalorder %s30_s17, 2  ;;  %p72_p1 = scmp.ne.s32.totalorder %s697_s11, %s693_s10 }
   0x9   : > { %p73_p2 = scmp.eq.s32.totalorder %s709_s14, 0  ;;  %p78_p3 = scmp.ne.s32.totalorder %s693_s10, %s689_s9 }
   0xa   : > { %s1056_s17 = smov (%p32_p0, %s30_s17), 0  ;;  %p79_p5 = scmp.eq.s32.totalorder %s491_s15, 0 }
   0xb   : > { %p772_p4 = por %p73_p2, %p72_p1  ;;  %s60_s20 = ssub.s32 %s705_s13, %s1056_s17 }
   0xc   : > { %p102_p6 = scmp.eq.s32.totalorder %s491_s15, 1  ;;  %p63_p7 = scmp.eq.s32.totalorder %s60_s20, 0 }
   0xd   : > { %p778_p8 = por %p79_p5, %p78_p3  ;;  %p108_p10 = scmp.eq.s32.totalorder %s492_s16, 1 }
   0xe   : > { %p782_p9 = por %p102_p6, %p72_p1  ;;  %p520_p13 = scmp.lt.s32.totalorder %s709_s14, 2 }
   0xf   : > { %s787_s23 = scalar_select %p63_p7, %s697_s11, %s65_s18  }
  0x10   : > { %s1040_s22 = scalar_select %p782_p9, 1, 0 }
  0x11   : > { %p789_p11 = por %p108_p10, %p78_p3  ;;  %s135_s25 = sand.u32 1, %s697_s11  }
  0x12   : > { %s495_s26 = sshll.u32 %s135_s25, 6  ;;  %s507_s27 = sshll.u32 %s705_s13, 10 }
  0x13   : > { %s1041_s24 = scalar_select %p789_p11, 1, 0 }
  0x14   : > { %s800_s30 = scalar_lea.hbm %s1035_s1, %s507_s27  ;;  %s139_s3 = scalar_lea.vmem [#allocation6], %s495_s26 }
  0x15   : > { %s149_s4 = sshll.u32 %s139_s3, 4  ;;  %p806_p0 = pnand %p520_p13, %p772_p4  ;;  %s802_s4 = int_to_ptr.vmem [resolvable:$true] %s149_s4 }
  0x16   : > { %s136_s6 = scalar_lea.sflag [#allocation7], %s135_s25  ;;  %s597_s7 = scalar_lea.hbm %s800_s30, 1024 }
  0x17   : > { %p598_p3 = scmp.ne.s32.totalorder %s800_s30, %s597_s7  ;;  %p599_p5 = pneg %p806_p0 }
  0x18   : > { %s602_s16 = scalar_lea.hbm %s1035_s1, 2048  ;;  %p603_p4 = scmp.lt.u32.totalorder %s800_s30, %s1035_s1 }
  0x19   : > { %p600_p6 = pnand %p599_p5, %p598_p3  ;;  %p604_p10 = scmp.lt.u32.totalorder %s602_s16, %s597_s7 }
  0x1a   : > { %p606_p12 = scmp.lt.u32.totalorder %s597_s7, %s800_s30 }
  0x1b   : > { %p601_p7 = pneg %p600_p6  ;;  %p605_p13 = por %p604_p10, %p603_p4 }
  0x1d   : > { %p607_p1 = por %p606_p12, %p605_p13 }
  0x1f   : > { %p608_p2 = pnand %p607_p1, %p601_p7 }
  0x21   : > { %611 = shalt.err (!%p608_p2)
}
  0x22   : > { %s612_s20 = scalar_lea.vmem %s802_s4, 1024  ;;  %s711_s25 = smov [#allocation6]  }
  0x23   : > { %p613_p3 = scmp.ne.s32.totalorder %s802_s4, %s612_s20  ;;  %s617_s26 = sshll.u32 %s711_s25, 4  ;;  %s618_s26 = int_to_ptr.vmem [resolvable:$false] %s617_s26 }
  0x24   : > { %s619_s27 = scalar_lea.vmem %s618_s26, 2048  ;;  %p620_p9 = scmp.lt.s32.totalorder %s802_s4, %s618_s26 }
  0x25   : > { %p615_p6 = pnand %p613_p3, %p599_p5  ;;  %p621_p4 = scmp.lt.s32.totalorder %s619_s27, %s612_s20 }
  0x27   : > { %p616_p11 = pneg %p615_p6  ;;  %p622_p10 = por %p621_p4, %p620_p9 }
  0x29   : > { %p623_p12 = pnand %p622_p10, %p616_p11 }
  0x2b   : > { %626 = shalt.err (!%p623_p12)
}
  0x2c   : > { %515 = dma.hbm_to_vmem [thread:$0]  (!%p806_p0), %s800_s30, 1024, %s802_s4, %s136_s6  }
  0x2d   : > { %p1043_p1 = scmp.lt.s32.totalorder %s709_s14, 3  ;;  %p1044_p2 = scmp.ge.s32.totalorder %s709_s14, 1 }
  0x2f   : > { %p155_p5 = pnand %p1044_p2, %p1043_p1 }
  0x30   : > { %s842_s28 = sand.u32 (!%p155_p5), 1, %s693_s10  }
  0x31   : > { %158 = sbr.rel (%p155_p5) target bundleno = 1002 (0x3ea), region = 28  ;;  %s499_s29 = sshll.u32 (!%p155_p5), %s842_s28, 6 }
  0x32   : > { %s161_s3 = scalar_lea.sflag (!%p155_p5), [#allocation7], %s842_s28  ;;  %s846_s7 = scalar_lea.vmem (!%p155_p5), [#allocation6], %s499_s29 }
  0x38   : > { %680 = dma.done.wait (%p778_p8), %s161_s3, 1024  }
  0x39   : > { %682 = vsyncadd (%p778_p8), %s161_s3, 4294966272  ;;  %p189_p9 = scmp.lt.s32.totalorder %s701_s12, 1  ;;  %v712_v0 = vmov 0   ;;  %v217_v2 = vlaneseq  ;;  %v194_v7 = vld [vmem:[%s846_s7] sm:$0xff]  ;;  %v872_v8 = vld [vmem:[%s846_s7 + $0x8] sm:$0xff]  ;;  %vm207_vm8 = vcmask 7168  }
  0x3a   : > { %573 = vset.pattern.permute.xlu0 %v712_v0  ;;  %574 = vset.pattern.permute.xlu1 %v712_v0  ;;  %v196_v10 = vld [vmem:[%s846_s7 + $0x10] sm:$0xff]  ;;  %v197_v14 = vld [vmem:[%s846_s7 + $0x18] sm:$0xff]  ;;  %v198_v18 = vld [vmem:[%s846_s7 + $0x20] sm:$0xff]  ;;  %v713_v35 = vmov 0.0   ;;  %v714_v36 = vmov -inf   ;;  %v282_v52 = vmul.f32 32.0, %v194_v7 }
  0x3b   : > { %s190_s30 = scalar_select %p189_p9, %s701_s12, 1  ;;  %v860_v3 = vand.u32 127, %v217_v2  ;;  %v199_v22 = vld [vmem:[%s846_s7 + $0x28] sm:$0xff]  ;;  %v200_v26 = vld [vmem:[%s846_s7 + $0x30] sm:$0xff]  ;;  %v201_v29 = vld [vmem:[%s846_s7 + $0x38] sm:$0xff]  ;;  %209 = vst.msk [vmem:[#allocation3] sm:$0xff] %vm207_vm8, %v713_v35 }
  0x3c   : > { %210 = vst.msk [vmem:[#allocation4] sm:$0xff] %vm207_vm8, %v713_v35  ;;  %208 = vst.msk [vmem:[#allocation2] sm:$0xff] %vm207_vm8, %v714_v36  ;;  %v287_v49 = vmul.f32 32.0, %v199_v22  ;;  %v283_v53 = vmul.f32 32.0, %v872_v8  ;;  %v284_v54 = vmul.f32 32.0, %v196_v10  ;;  %v285_v55 = vmul.f32 32.0, %v197_v14 }
  0x3d   : > { %s501_s4 = sshll.u32 %s190_s30, 3  ;;  %v863_v4 = vadd.s32 128, %v860_v3  ;;  %v866_v5 = vadd.s32 256, %v860_v3  ;;  %v875_v9 = vadd.s32 384, %v860_v3  ;;  %v883_v11 = vadd.s32 512, %v860_v3  ;;  %s500_s21 = sshll.u32 %s842_s28, 3 }
  0x3e   : > { %s192_s8 = scalar_lea.vmem %s1034_s0, %s501_s4  ;;  %v896_v15 = vadd.s32 640, %v860_v3  ;;  %v905_v19 = vadd.s32 768, %v860_v3  ;;  %v914_v23 = vadd.s32 896, %v860_v3  ;;  %v288_v56 = vmul.f32 32.0, %v200_v26  ;;  %s188_s15 = scalar_lea.vmem [#allocation9], %s500_s21 }
  0x3f   : > { %v857_v1 = vld [vmem:[%s192_s8] sm:$0xff]  ;;  %v289_v57 = vmul.f32 32.0, %v201_v29  ;;  %v286_v59 = vmul.f32 32.0, %v198_v18  ;;  %s398_s16 = sshll.u32 %s188_s15, 4  ;;  %s504_s18 = sshll.u32 %s701_s12, 7  ;;  %s982_s16 = int_to_ptr.vmem [resolvable:$true] %s398_s16 }
  0x40   : > { %227 = vperm.xlu0 %573, %v857_v1   ;;  %vm214_vm11 = vcmp.ge.s32.totalorder %v857_v1, 0  ;;  %vm215_vm12 = vcmp.lt.s32.totalorder %v857_v1, 1024  ;;  %vm246_vm14 = vcmp.lt.s32.totalorder %v914_v23, 1000  ;;  %s987_s25 = scalar_lea.hbm %s1036_s2, %s504_s18  ;;  %s385_s26 = scalar_lea.sflag [#allocation8], %s842_s28 }
  0x41   : > { %vm947_vm15 = vmand %vm214_vm11, %vm215_vm12  ;;  %s627_s27 = scalar_lea.vmem %s982_s16, 128  ;;  %p1047_p11 = scmp.ne.s32.totalorder %s1040_s22, 0 }
  0x42   : > { %p628_p8 = scmp.ne.s32.totalorder %s982_s16, %s627_s27  ;;  %s715_s29 = smov [#allocation9]  }
  0x43   : > { %s631_s12 = sshll.u32 %s715_s29, 4  ;;  %s632_s12 = int_to_ptr.vmem [resolvable:$false] %s631_s12 }
  0x44   : > { %p629_p0 = pnand %p628_p8, %p1047_p11  ;;  %s633_s3 = scalar_lea.vmem %s632_s12, 256 }
  0x45   : > { %p634_p13 = scmp.lt.s32.totalorder %s982_s16, %s632_s12  ;;  %p635_p3 = scmp.lt.s32.totalorder %s633_s3, %s627_s27 }
  0x46   : > { %p630_p7 = pneg %p629_p0 }
  0x47   : > { %p636_p6 = por %p635_p3, %p634_p13 }
  0x49   : > { %p637_p4 = pnand %p636_p6, %p630_p7 }
  0xbf   : > { %v868_v6 = vpop.permute.xlu0 %227 }
  0xc0   : > { %vm229_vm0 = vcmp.eq.s32.totalorder %v860_v3, %v868_v6  ;;  %vm230_vm1 = vcmp.eq.s32.totalorder %v863_v4, %v868_v6  ;;  %vm231_vm2 = vcmp.eq.s32.totalorder %v866_v5, %v868_v6  ;;  %vm232_vm3 = vcmp.eq.s32.totalorder %v875_v9, %v868_v6 }
  0xc1   : > { %v247_v12 = vsel %vm229_vm0, %v194_v7, 0.0  ;;  %v248_v13 = vsel %vm230_vm1, %v872_v8, 0.0  ;;  %v249_v17 = vsel %vm231_vm2, %v196_v10, 0.0  ;;  %vm233_vm4 = vcmp.eq.s32.totalorder %v883_v11, %v868_v6  ;;  %v364_v7 = vld [vmem:[#allocation4] sm:$0xff] }
  0xc2   : > { %v255_v16 = vadd.f32 %v248_v13, %v247_v12  ;;  %v250_v21 = vsel %vm232_vm3, %v197_v14, 0.0  ;;  %vm234_vm5 = vcmp.eq.s32.totalorder %v896_v15, %v868_v6  ;;  %v251_v25 = vsel %vm233_vm4, %v198_v18, 0.0  ;;  %v306_v18 = vld [vmem:[#allocation2] sm:$0xff] }
  0xc3   : > { %vm235_vm6 = vcmp.eq.s32.totalorder %v905_v19, %v868_v6  ;;  %v252_v28 = vsel %vm234_vm5, %v199_v22, 0.0  ;;  %vm236_vm7 = vcmp.eq.s32.totalorder %v914_v23, %v868_v6 }
  0xc4   : > { %v256_v20 = vadd.f32 %v255_v16, %v249_v17  ;;  %v253_v31 = vsel %vm235_vm6, %v200_v26, 0.0  ;;  %v254_v33 = vsel %vm236_vm7, %v201_v29, 0.0 }
  0xc6   : > { %v257_v24 = vadd.f32 %v256_v20, %v250_v21 }
  0xc8   : > { %v258_v27 = vadd.f32 %v257_v24, %v251_v25 }
  0xca   : > { %v259_v30 = vadd.f32 %v258_v27, %v252_v28 }
  0xcc   : > { %v260_v32 = vadd.f32 %v259_v30, %v253_v31 }
  0xce   : > { %v261_v34 = vadd.f32 %v260_v32, %v254_v33 }
  0xd0   : > { %262 = vadd.xlane.f32.xlu0 %v261_v34 }
 0x15d   : > { %v263_v37 = vpop.xlane.xlu0 %262 }
 0x15e   : > { %v264_v38 = vmul.f32 %v263_v37, %v263_v37  ;;  %v275_v47 = vmul.f32 0.9800666, %v263_v37  ;;  %v502_v51 = vadd.f32 -0.019933423, %v263_v37  ;;  %vm278_vm13 = vcmp.gt.f32.partialorder %v263_v37, -0.9800666 }
 0x160   : > { %v265_v39 = vsub.f32 1.0, %v264_v38 }
 0x162   : > { %v266_v40 = vmax.f32 %v265_v39, 0.0 }
 0x164   : > { %v267_v41 = vmin.f32 %v266_v40, 1.0 }
 0x166   : > { %575 = vrsqrt.f32 %v267_v41  ;;  %vm270_vm9 = vcmp.eq.f32.partialorder %v267_v41, inf  ;;  %v273_v44 = vand.u32 2147483648, %v267_v41  ;;  %vm272_vm10 = vcmp.eq.f32.partialorder %v267_v41, 0.0 }
 0x170   : > { %v576_v42 = vpop.eup %575 }
 0x171   : > { %v269_v43 = vmul.f32 %v576_v42, %v267_v41 }
 0x173   : > { %v271_v45 = vsel %vm270_vm9, %v267_v41, %v269_v43 }
 0x174   : > { %v274_v46 = vsel %vm272_vm10, %v273_v44, %v271_v45 }
 0x175   : > { %v276_v48 = vmul.f32 0.19866933, %v274_v46 }
 0x177   : > { %v277_v50 = vsub.f32 %v275_v47, %v276_v48 }
 0x179   : > { %v280_v58 = vsel %vm278_vm13, %v277_v50, %v502_v51 }
 0x17a   : > { %v281_v60 = vmul.f32 32.0, %v280_v58 }
 0x17c   : > { %v290_v62 = vsel %vm229_vm0, %v281_v60, %v282_v52  ;;  %v291_v63 = vsel %vm230_vm1, %v281_v60, %v283_v53  ;;  %v292_v0 = vsel %vm231_vm2, %v281_v60, %v284_v54  ;;  %v293_v1 = vsel %vm232_vm3, %v281_v60, %v285_v55  ;;  %v358_v55 = vld [vmem:[#allocation3] sm:$0xff] }
 0x17d   : > { %v294_v2 = vsel %vm233_vm4, %v281_v60, %v286_v59  ;;  %v295_v3 = vsel %vm234_vm5, %v281_v60, %v287_v49  ;;  %v296_v4 = vsel %vm235_vm6, %v281_v60, %v288_v56  ;;  %v297_v5 = vsel %vm236_vm7, %v281_v60, %v289_v57 }
 0x17e   : > { %v305_v8 = vsel %vm246_vm14, %v297_v5, -inf  ;;  %v307_v9 = vmax.f32 %v290_v62, %v294_v2  ;;  %v308_v10 = vmax.f32 %v291_v63, %v295_v3  ;;  %v309_v12 = vmax.f32 %v292_v0, %v296_v4 }
 0x17f   : > { %v310_v13 = vmax.f32 %v293_v1, %v305_v8  ;;  %v365_v11 = vsel %vm947_vm15, %v281_v60, 0.0 }
 0x180   : > { %v311_v14 = vmax.f32 %v307_v9, %v308_v10  ;;  %v366_v15 = vadd.f32 %v365_v11, %v364_v7 }
 0x181   : > { %v312_v16 = vmax.f32 %v309_v12, %v310_v13 }
 0x182   : > { %367 = vst.msk [vmem:[#allocation4] sm:$0xff] %vm207_vm8, %v366_v15 }
 0x183   : > { %v313_v17 = vmax.f32 %v311_v14, %v312_v16 }
 0x185   : > { %314 = vmax.xlane.f32.xlu1 %v313_v17 }
 0x212   : > { %v315_v19 = vpop.xlane.xlu1 %314 }
 0x213   : > { %v316_v6 = vmax.f32 %v306_v18, %v315_v19 }
 0x215   : > { %v317_v20 = vsub.f32 %v306_v18, %v316_v6  ;;  %363 = vst.msk [vmem:[#allocation2] sm:$0xff] %vm207_vm8, %v316_v6  ;;  %322 = vperm.xlu1 %574, %v316_v6  }
 0x217   : > { %v318_v53 = vmul.f32 1.442695, %v317_v20 }
 0x294   : > { %v323_v21 = vpop.permute.xlu1 %322 }
 0x295   : > { %v325_v22 = vsub.f32 %v290_v62, %v323_v21  ;;  %v326_v23 = vsub.f32 %v291_v63, %v323_v21  ;;  %v327_v24 = vsub.f32 %v292_v0, %v323_v21  ;;  %v328_v25 = vsub.f32 %v293_v1, %v323_v21  ;;  %v371_v62 = vld [vmem:[#allocation2] sm:$0xff]  ;;  %v376_v0 = vld [vmem:[#allocation4] sm:$0xff] }
 0x296   : > { %v329_v29 = vsub.f32 %v294_v2, %v323_v21  ;;  %v330_v31 = vsub.f32 %v295_v3, %v323_v21  ;;  %v331_v32 = vsub.f32 %v296_v4, %v323_v21  ;;  %v332_v34 = vsub.f32 %v305_v8, %v323_v21 }
 0x297   : > { %v333_v26 = vmul.f32 1.442695, %v325_v22  ;;  %v335_v27 = vmul.f32 1.442695, %v326_v23  ;;  %v337_v28 = vmul.f32 1.442695, %v327_v24 }
 0x298   : > { %v339_v30 = vmul.f32 1.442695, %v328_v25  ;;  %v341_v33 = vmul.f32 1.442695, %v329_v29  ;;  %v343_v35 = vmul.f32 1.442695, %v330_v31 }
 0x299   : > { %577 = vpow2.f32 %v333_v26  ;;  %v345_v36 = vmul.f32 1.442695, %v331_v32  ;;  %v347_v37 = vmul.f32 1.442695, %v332_v34 }
 0x29a   : > { %579 = vpow2.f32 %v335_v27 }
 0x29b   : > { %581 = vpow2.f32 %v337_v28 }
 0x29c   : > { %583 = vpow2.f32 %v339_v30 }
 0x29d   : > { %585 = vpow2.f32 %v341_v33 }
 0x29e   : > { %587 = vpow2.f32 %v343_v35 }
 0x29f   : > { %589 = vpow2.f32 %v345_v36 }
 0x2a0   : > { %591 = vpow2.f32 %v347_v37 }
 0x2a1   : > { %593 = vpow2.f32 %v318_v53 }
 0x2a3   : > { %v578_v38 = vpop.eup %577 }
 0x2a4   : > { %v580_v39 = vpop.eup %579 }
 0x2a5   : > { %v349_v40 = vadd.f32 %v580_v39, %v578_v38  ;;  %v582_v41 = vpop.eup %581 }
 0x2a6   : > { %v584_v43 = vpop.eup %583 }
 0x2a7   : > { %v350_v42 = vadd.f32 %v582_v41, %v349_v40  ;;  %v586_v45 = vpop.eup %585 }
 0x2a8   : > { %v588_v47 = vpop.eup %587 }
 0x2a9   : > { %v351_v44 = vadd.f32 %v584_v43, %v350_v42  ;;  %v590_v49 = vpop.eup %589 }
 0x2aa   : > { %v592_v51 = vpop.eup %591 }
 0x2ab   : > { %v352_v46 = vadd.f32 %v586_v45, %v351_v44  ;;  %v594_v54 = vpop.eup %593 }
 0x2ac   : > { %v359_v56 = vmul.f32 %v594_v54, %v358_v55 }
 0x2ad   : > { %v353_v48 = vadd.f32 %v588_v47, %v352_v46 }
 0x2af   : > { %v354_v50 = vadd.f32 %v590_v49, %v353_v48 }
 0x2b1   : > { %v355_v52 = vadd.f32 %v592_v51, %v354_v50 }
 0x2b3   : > { %356 = vadd.xlane.f32.xlu1 %v355_v52 }
 0x340   : > { %v357_v57 = vpop.xlane.xlu1 %356 }
 0x341   : > { %v360_v58 = vadd.f32 %v359_v56, %v357_v57 }
 0x343   : > { %362 = vst.msk [vmem:[#allocation3] sm:$0xff] %vm207_vm8, %v360_v58 }
 0x34a   : > { %v372_v59 = vld [vmem:[#allocation3] sm:$0xff] }
 0x34b   : > { %595 = vlog2.f32 %v372_v59 }
 0x355   : > { %v596_v60 = vpop.eup %595 }
 0x356   : > { %v374_v61 = vmul.f32 0.6931472, %v596_v60 }
 0x358   : > { %v375_v63 = vadd.f32 %v374_v61, %v371_v62 }
 0x35a   : > { %v377_v1 = vsub.f32 %v375_v63, %v376_v0 }
 0x35c   : > { %380 = vperm.xlu0 %573, %v377_v1  }
 0x3db   : > { %v381_v2 = vpop.permute.xlu0 %380 }
 0x3dc   : > { %383 = vst [vmem:[%s188_s15] sm:$0xff] %v381_v2 }
 0x3dd   : > { %640 = shalt.err (!%p637_p4)
}
 0x3de   : > { %s641_s28 = scalar_lea.hbm %s987_s25, 128  ;;  %s645_s4 = scalar_lea.hbm %s1036_s2, 256 }
 0x3df   : > { %p642_p10 = scmp.ne.s32.totalorder %s987_s25, %s641_s28  ;;  %p646_p2 = scmp.lt.u32.totalorder %s987_s25, %s1036_s2 }
 0x3e0   : > { %p647_p5 = scmp.lt.u32.totalorder %s645_s4, %s641_s28  ;;  %p649_p8 = scmp.lt.u32.totalorder %s641_s28, %s987_s25 }
 0x3e1   : > { %p643_p12 = pnand %p642_p10, %p1047_p11 }
 0x3e2   : > { %p648_p9 = por %p647_p5, %p646_p2 }
 0x3e3   : > { %p644_p1 = pneg %p643_p12 }
 0x3e4   : > { %p650_p0 = por %p649_p8, %p648_p9 }
 0x3e6   : > { %p651_p7 = pnand %p650_p0, %p644_p1 }
 0x3e8   : > { %654 = shalt.err (!%p651_p7)
}
 0x3e9   : > { %510 = dma.vmem_to_hbm [thread:$0]  (%p1047_p11), %s982_s16, 128, %s987_s25, %s385_s26  }
 0x3ea PF: > { %s410_s8 = sand.u32 1, %s689_s9   ;;  %p1048_p13 = scmp.ne.s32.totalorder %s1041_s24, 0 }
 0x3eb   : > { %p1049_p3 = scmp.ge.s32.totalorder %s709_s14, 2  ;;  %s411_s21 = scalar_lea.sflag [#allocation8], %s410_s8 }
 0x3ed   : > { %p517_p6 = pnand %p1049_p3, %p1048_p13 }
 0x3ef   : > { %684 = dma.done.wait (!%p517_p6), %s411_s21, 128  }
 0x3f0   : > { %686 = vsyncadd (!%p517_p6), %s411_s21, 4294967168  ;;  %s18_s14 = sadd.s32 1, %s709_s14   ;;  %s1050_s9 = smov %s693_s10 }
 0x3f1   : > { %p15_p4 = scmp.ge.s32.totalorder %s18_s14, 4   ;;  %s1051_s10 = smov %s697_s11 }
 0x3f2   : > { %s1052_s11 = smov %s787_s23  ;;  %s1053_s12 = smov %s705_s13 }
 0x3f3   : > { %s1054_s13 = smov %s1056_s17  ;;  %17 = sbr.rel (!%p15_p4) target bundleno = 6 (0x6), region = 84 }
 0x3fa   :  { %416 = vsyncpa [#allocation7], 1 }
 0x3fb   :  { %418 = vsyncpa [#allocation7 + $0x1], 1 }
 0x3fc   :  { %419 = vsyncpa [#allocation8], 1 }
 0x3fd   :  { %421 = vsyncpa [#allocation8 + $0x1], 1 }

</bundles_post_ra>
